<compile_context>
chip_gen: v5e
topology: v5e:2x2
jax: 0.10.0
libtpu: 0.0.40
codegen_flags: <defaults>
</compile_context>

<pallas_src>
import functools

import jax
import jax.numpy as jnp
from jax.experimental import pallas as pl
from jax.experimental.pallas import tpu as pltpu


def _round_up(x, m):
    return ((x + m - 1) // m) * m


def _vmem_capacity_bytes():
    """Physical VMEM per core on this chip; conservative fallback."""
    try:
        return int(pltpu.get_tpu_info().vmem_capacity_bytes)
    except Exception:
        return 64 * 1024 * 1024  # v7x per-TensorCore minimum


def _choose_batch_tile(B, per_image_bytes, budget):
    """Largest divisor of B whose pipelined footprint fits `budget`, while
    keeping >= 2 grid steps when B >= 2 (so v7x's 2nd TensorCore has work)."""
    best = 1
    for bt in range(1, B + 1):
        if B % bt:
            continue
        if bt * per_image_bytes > budget:
            continue
        if B >= 2 and B // bt < 2:
            continue
        best = bt
    return best


# ---------------------------------------------------------------------------
# Kernel 1: fully fused, single pass. One grid step = one (Bt, C, HWp) tile.
# ---------------------------------------------------------------------------
def _se_fused_kernel(x_ref, fc1_ref, fc2_ref, o_ref, *, inv_hw):
    # x_ref : (Bt, C, HWp)  channels on sublanes, H*W on lanes (lane-dense)
    # fc1   : (C, Hid)  torch fc1 weight (Hid, C) transposed
    # fc2   : (C, Hid)  torch fc2 weight (C, Hid) as-is
    x = x_ref[...].astype(jnp.float32)

    # squeeze: global average pool (cross-lane reduce, XLU). Padded zero lanes
    # add nothing to the sum; inv_hw uses the *true* H*W.
    pooled = jnp.sum(x, axis=-1, keepdims=True) * inv_hw                # (Bt, C, 1)

    # excitation: two tiny FCs as broadcast-mul + reduce (VPU+XLU); the hidden
    # dim is never padded up to an MXU tile.
    h = jnp.maximum(
        jnp.sum(fc1_ref[...][None] * pooled, axis=1, keepdims=True), 0.0)   # (Bt,1,Hid)
    gate = jax.nn.sigmoid(
        jnp.sum(fc2_ref[...][None] * h, axis=2, keepdims=True))             # (Bt,C,1)

    # scale: channel gating broadcast over lanes (full-width VPU), cast back.
    o_ref[...] = (x * gate).astype(o_ref.dtype)


# ---------------------------------------------------------------------------
# Kernel 2: HW-banded two-pass kernel for images too big for a single tile.
# grid = (B, 2, n_bands); phase 0 = pool partial sums, phase 1 = gate + scale.
# ---------------------------------------------------------------------------
def _se_banded_kernel(x_ref, fc1_ref, fc2_ref, o_ref, pool_ref, gate_ref, *,
                      inv_hw):
    phase = pl.program_id(1)
    band = pl.program_id(2)

    @pl.when(jnp.logical_and(phase == 0, band == 0))
    def _():
        pool_ref[...] = jnp.zeros_like(pool_ref)

    @pl.when(phase == 0)
    def _():
        x = x_ref[0].astype(jnp.float32)                       # (C, band_hw)
        pool_ref[...] += jnp.sum(x, axis=-1, keepdims=True)    # (C, 1)

    @pl.when(jnp.logical_and(phase == 1, band == 0))
    def _():
        pooled = pool_ref[...] * inv_hw                        # (C, 1)
        h = jnp.maximum(
            jnp.sum(fc1_ref[...] * pooled, axis=0, keepdims=True), 0.0)   # (1, Hid)
        gate_ref[...] = jax.nn.sigmoid(
            jnp.sum(fc2_ref[...] * h, axis=1, keepdims=True))             # (C, 1)

    @pl.when(phase == 1)
    def _():
        x = x_ref[0].astype(jnp.float32)
        o_ref[0] = (x * gate_ref[...]).astype(o_ref.dtype)


# ---------------------------------------------------------------------------
# Wrapper: PyTorch-style NCHW in / NCHW out.
# ---------------------------------------------------------------------------
def se_layer(x_nchw, fc1_w, fc2_w, *, force_band_hw=None, force_batch_tile=None):
    """SELayer forward.

    x_nchw : (B, C, H, W) float32 or bfloat16
    fc1_w  : (C//r, C)  torch Linear(channel, channel//r, bias=False).weight
    fc2_w  : (C, C//r)  torch Linear(channel//r, channel, bias=False).weight
    """
    B, C, H, W = x_nchw.shape
    HW = H * W
    Hid = fc1_w.shape[0]
    elt = jnp.dtype(x_nchw.dtype).itemsize
    inv_hw = 1.0 / float(HW)

    fc1_t = jnp.asarray(fc1_w, jnp.float32).T        # (C, Hid), tiny, once
    fc2 = jnp.asarray(fc2_w, jnp.float32)             # (C, Hid)

    # ---- static tile selection from this chip's VMEM capacity ----
    vmem_limit = min(_vmem_capacity_bytes(), 128 * 1024 * 1024)
    budget = int(0.75 * vmem_limit)
    # 2 input + 2 output pipeline buffers (elt bytes each) + an in-kernel f32
    # temp of the tile.
    bytes_per_elem = 4 * elt + 4

    HWp = _round_up(HW, 128)                 # lane-dense stores (unmasked vst)
    per_image = C * HWp * bytes_per_elem

    flops = 4 * B * C * HW
    transcendentals = B * C

    if force_band_hw is None and per_image <= budget:
        # ---------------- single-pass fused path ----------------
        if force_batch_tile is not None:
            assert B % int(force_batch_tile) == 0
            bt = int(force_batch_tile)
        else:
            bt = _choose_batch_tile(B, per_image, budget)

        x = x_nchw.reshape(B, C, HW)
        if HWp != HW:
            x = jnp.pad(x, ((0, 0), (0, 0), (0, HWp - HW)))

        out = pl.pallas_call(
            functools.partial(_se_fused_kernel, inv_hw=inv_hw),
            out_shape=jax.ShapeDtypeStruct((B, C, HWp), x_nchw.dtype),
            grid=(B // bt,),
            in_specs=[
                pl.BlockSpec((bt, C, HWp), lambda b: (b, 0, 0)),
                pl.BlockSpec((C, Hid), lambda b: (0, 0)),
                pl.BlockSpec((C, Hid), lambda b: (0, 0)),
            ],
            out_specs=pl.BlockSpec((bt, C, HWp), lambda b: (b, 0, 0)),
            compiler_params=pltpu.CompilerParams(
                dimension_semantics=("parallel",),
                vmem_limit_bytes=vmem_limit),
            cost_estimate=pl.CostEstimate(
                flops=flops, transcendentals=transcendentals,
                bytes_accessed=2 * B * C * HWp * elt),
        )(x, fc1_t, fc2)
    else:
        # ---------------- banded two-pass path (large HW / v7x) ----------------
        if force_band_hw is not None:
            band = int(force_band_hw)
            assert band % 128 == 0
        else:
            band = max(128, (budget // (C * bytes_per_elem)) // 128 * 128)
        band = min(band, _round_up(HW, 128))
        HWp = _round_up(HW, band)
        n_bands = HWp // band

        x = x_nchw.reshape(B, C, HW)
        if HWp != HW:
            x = jnp.pad(x, ((0, 0), (0, 0), (0, HWp - HW)))

        out = pl.pallas_call(
            functools.partial(_se_banded_kernel, inv_hw=inv_hw),
            out_shape=jax.ShapeDtypeStruct((B, C, HWp), x_nchw.dtype),
            grid=(B, 2, n_bands),
            in_specs=[
                pl.BlockSpec((1, C, band), lambda b, p, j: (b, 0, j)),
                pl.BlockSpec((C, Hid), lambda b, p, j: (0, 0)),
                pl.BlockSpec((C, Hid), lambda b, p, j: (0, 0)),
            ],
            # Phase 0 pins the output block at band 0 (never written there, no
            # intermediate writeback); phase 1 streams the gated bands out.
            out_specs=pl.BlockSpec((1, C, band), lambda b, p, j: (b, 0, j * p)),
            scratch_shapes=[
                pltpu.VMEM((C, 1), jnp.float32),   # per-channel pool partials
                pltpu.VMEM((C, 1), jnp.float32),   # per-channel gate
            ],
            compiler_params=pltpu.CompilerParams(
                dimension_semantics=("parallel", "arbitrary", "arbitrary"),
                vmem_limit_bytes=vmem_limit),
            cost_estimate=pl.CostEstimate(
                flops=flops, transcendentals=transcendentals,
                bytes_accessed=3 * B * C * HWp * elt),  # x read twice + out
        )(x, fc1_t, fc2)

    if HWp != HW:
        out = out[:, :, :HW]
    return out.reshape(B, C, H, W)


# ---------------------------------------------------------------------------
# Pure-JAX reference (exact SELayer.forward semantics)
# ---------------------------------------------------------------------------
def se_layer_ref(x, fc1_w, fc2_w):
    x32 = x.astype(jnp.float32)
    pooled = jnp.mean(x32, axis=(2, 3))                         # (B, C)
    h = jnp.maximum(pooled @ fc1_w.T, 0.0)
    gate = jax.nn.sigmoid(h @ fc2_w.T)                          # (B, C)
    return x32 * gate[:, :, None, None]


# ---------------------------------------------------------------------------
# Demo / self-check
# ---------------------------------------------------------------------------
if __name__ == "__main__":
    B, C, H, W = 2, 32, 16, 16            # channel=32, reduction=16 -> hid=2
    reduction = 16
    hid = C // reduction

    key = jax.random.PRNGKey(0)
    kx, k1, k2, ko = jax.random.split(key, 4)
    x = jax.random.normal(kx, (B, C, H, W), jnp.float32)          # NCHW
    fc1_w = 0.3 * jax.random.normal(k1, (hid, C), jnp.float32)    # torch (out,in)
    fc2_w = 0.3 * jax.random.normal(k2, (C, hid), jnp.float32)

    ref = se_layer_ref(x, fc1_w, fc2_w)

    # 1) fused single-pass path (auto-tiled from VMEM capacity)
    out = jax.block_until_ready(se_layer(x, fc1_w, fc2_w))
    assert out.shape == (B, C, H, W) and out.dtype == jnp.float32
    assert jnp.allclose(out, ref, atol=1e-5, rtol=1e-5), float(
        jnp.max(jnp.abs(out - ref)))

    # 2) banded two-pass path (forced small bands; the large-HW / v7x path)
    out_b = jax.block_until_ready(se_layer(x, fc1_w, fc2_w, force_band_hw=128))
    assert jnp.allclose(out_b, ref, atol=1e-5, rtol=1e-5), float(
        jnp.max(jnp.abs(out_b - ref)))

    # 3) bf16 I/O (all math stays f32 inside the kernel)
    x16 = x.astype(jnp.bfloat16)
    ref16 = se_layer_ref(x16, fc1_w, fc2_w)
    out16 = jax.block_until_ready(se_layer(x16, fc1_w, fc2_w))
    assert out16.dtype == jnp.bfloat16
    assert jnp.allclose(out16.astype(jnp.float32), ref16, atol=5e-2, rtol=5e-2)

    # 4) H*W not a multiple of 128 (lane-dense padding path)
    x_odd = jax.random.normal(ko, (B, C, 10, 10), jnp.float32)
    ref_odd = se_layer_ref(x_odd, fc1_w, fc2_w)
    out_odd = jax.block_until_ready(se_layer(x_odd, fc1_w, fc2_w))
    assert out_odd.shape == (B, C, 10, 10)
    assert jnp.allclose(out_odd, ref_odd, atol=1e-5, rtol=1e-5), float(
        jnp.max(jnp.abs(out_odd - ref_odd)))

    print("KERNEL_OK")
</pallas_src>

<mosaic_0001>
module attributes {stable_mosaic.version = 11 : i64} {
  func.func @_se_fused_kernel(%arg0: i32, %arg1: memref<1x32x256xf32, #tpu.memory_space<vmem>>, %arg2: memref<32x2xf32, #tpu.memory_space<vmem>>, %arg3: memref<32x2xf32, #tpu.memory_space<vmem>>, %arg4: memref<1x32x256xf32, #tpu.memory_space<vmem>>) attributes {dimension_semantics = [#tpu.dimension_semantics<parallel>], iteration_bounds = array<i64: 2>, scalar_prefetch = 0 : i64, scratch_operands = 0 : i64, tpu.core_type = #tpu.core_type<tc>, window_params = [{transform_indices = @transform_0, window_bounds = array<i64: 1, 32, 256>}, {pipeline_mode = #tpu.pipeline_mode<synchronous>, transform_indices = @transform_1, window_bounds = array<i64: 32, 2>}, {pipeline_mode = #tpu.pipeline_mode<synchronous>, transform_indices = @transform_2, window_bounds = array<i64: 32, 2>}, {transform_indices = @transform_3, window_bounds = array<i64: 1, 32, 256>}]} {
    %c0 = arith.constant 0 : index
    %c0_0 = arith.constant 0 : index
    %c0_1 = arith.constant 0 : index
    %0 = vector.load %arg1[%c0, %c0_0, %c0_1] : memref<1x32x256xf32, #tpu.memory_space<vmem>>, vector<1x32x256xf32>
    %cst = arith.constant dense<0.000000e+00> : vector<1x32xf32>
    %1 = vector.multi_reduction <add>, %0, %cst [2] : vector<1x32x256xf32> to vector<1x32xf32>
    %2 = vector.shape_cast %1 : vector<1x32xf32> to vector<1x32x1xf32>
    %cst_2 = arith.constant 3.906250e-03 : f32
    %3 = vector.broadcast %cst_2 : f32 to vector<1x32x1xf32>
    %4 = arith.mulf %2, %3 : vector<1x32x1xf32>
    %c0_3 = arith.constant 0 : index
    %c0_4 = arith.constant 0 : index
    %5 = vector.load %arg2[%c0_3, %c0_4] : memref<32x2xf32, #tpu.memory_space<vmem>>, vector<32x2xf32>
    %6 = vector.shape_cast %5 : vector<32x2xf32> to vector<1x32x2xf32>
    %7 = vector.broadcast %4 : vector<1x32x1xf32> to vector<1x32x2xf32>
    %8 = arith.mulf %6, %7 : vector<1x32x2xf32>
    %cst_5 = arith.constant dense<0.000000e+00> : vector<1x2xf32>
    %9 = vector.multi_reduction <add>, %8, %cst_5 [1] : vector<1x32x2xf32> to vector<1x2xf32>
    %10 = vector.shape_cast %9 : vector<1x2xf32> to vector<1x1x2xf32>
    %cst_6 = arith.constant 0.000000e+00 : f32
    %11 = vector.broadcast %cst_6 : f32 to vector<1x1x2xf32>
    %12 = arith.maximumf %10, %11 : vector<1x1x2xf32>
    %c0_7 = arith.constant 0 : index
    %c0_8 = arith.constant 0 : index
    %13 = vector.load %arg3[%c0_7, %c0_8] : memref<32x2xf32, #tpu.memory_space<vmem>>, vector<32x2xf32>
    %14 = vector.shape_cast %13 : vector<32x2xf32> to vector<1x32x2xf32>
    %15 = vector.broadcast %12 : vector<1x1x2xf32> to vector<1x32x2xf32>
    %16 = arith.mulf %14, %15 : vector<1x32x2xf32>
    %cst_9 = arith.constant dense<0.000000e+00> : vector<1x32xf32>
    %17 = vector.multi_reduction <add>, %16, %cst_9 [2] : vector<1x32x2xf32> to vector<1x32xf32>
    %18 = vector.shape_cast %17 : vector<1x32xf32> to vector<1x32x1xf32>
    %19 = arith.negf %18 : vector<1x32x1xf32>
    %20 = math.exp %19 : vector<1x32x1xf32>
    %cst_10 = arith.constant 1.000000e+00 : f32
    %21 = vector.broadcast %cst_10 : f32 to vector<1x32x1xf32>
    %22 = arith.addf %21, %20 : vector<1x32x1xf32>
    %23 = arith.divf %21, %22 : vector<1x32x1xf32>
    %24 = vector.broadcast %23 : vector<1x32x1xf32> to vector<1x32x256xf32>
    %25 = arith.mulf %0, %24 : vector<1x32x256xf32>
    %c0_11 = arith.constant 0 : index
    %c0_12 = arith.constant 0 : index
    %c0_13 = arith.constant 0 : index
    %26 = vector.load %arg4[%c0_11, %c0_12, %c0_13] : memref<1x32x256xf32, #tpu.memory_space<vmem>>, vector<1x32x256xf32>
    tpu.vector_store %arg4[%c0_11, %c0_12, %c0_13], %25 {strides = array<i32>} : memref<1x32x256xf32, #tpu.memory_space<vmem>>, vector<1x32x256xf32>,
    return
  }
  func.func @transform_0(%arg0: i32) -> (i32, i32, i32) {
    %c0_i32 = arith.constant 0 : i32
    %c0_i32_0 = arith.constant 0 : i32
    %c0_i32_1 = arith.constant 0 : i32
    return %arg0, %c0_i32, %c0_i32_0 : i32, i32, i32
  }
  func.func @transform_1(%arg0: i32) -> (i32, i32) {
    %c0_i32 = arith.constant 0 : i32
    %c0_i32_0 = arith.constant 0 : i32
    %c0_i32_1 = arith.constant 0 : i32
    return %c0_i32, %c0_i32_0 : i32, i32
  }
  func.func @transform_2(%arg0: i32) -> (i32, i32) {
    %c0_i32 = arith.constant 0 : i32
    %c0_i32_0 = arith.constant 0 : i32
    %c0_i32_1 = arith.constant 0 : i32
    return %c0_i32, %c0_i32_0 : i32, i32
  }
  func.func @transform_3(%arg0: i32) -> (i32, i32, i32) {
    %c0_i32 = arith.constant 0 : i32
    %c0_i32_0 = arith.constant 0 : i32
    %c0_i32_1 = arith.constant 0 : i32
    return %arg0, %c0_i32, %c0_i32_0 : i32, i32, i32
  }
}

</mosaic_0001>

<bundles_post_ra>
// kernel: tpu_custom_call.1
= control target key start
LH: loop header
LB: loop body
LE: loop exit
PB: predicated region body
PF: predicated region fallthrough
CT: control target
= control target key end

     0   :  { %8 = vsyncpa [#allocation3], 0  ;;  %s860_s0 = inlined_call_operand.hbm [shape: f32[2,32,256], index: 0, kind: input, shape index: {}]   ;;  %s861_s1 = inlined_call_operand.vmem [shape: f32[32,2], index: 1, kind: input, shape index: {}]   ;;  %s862_s2 = inlined_call_operand.vmem [shape: f32[32,2], index: 2, kind: input, shape index: {}]   ;;  %s863_s3 = inlined_call_operand.hbm [shape: f32[2,32,256], index: 3, kind: output, shape index: {}]  }
   0x1   :  { %10 = vsyncpa [#allocation3 + $0x1], 0 }
   0x2   :  { %11 = vsyncpa [#allocation4], 0 }
   0x3   :  { %13 = vsyncpa [#allocation4 + $0x1], 0  ;;  %s647_s12 = smov 0   ;;  %s649_s13 = smov 0  }
   0x4   :  { %s651_s14 = smov 0   ;;  %s653_s15 = smov 0  }
   0x5 LB: > { %s668_s16 = sadd.s32 4294967295, %s621_s15   ;;  %s439_s17 = sadd.s32 4294967294, %s621_s15   ;;  %s621_s15 = sphi %s653_s15, %s873_s15   ;;  %s617_s14 = sphi %s651_s14, %s872_s14   ;;  %s613_s13 = sphi %s649_s13, %s871_s13   ;;  %s609_s12 = sphi %s647_s12, %s870_s12  }
   0x6   : > { %s672_s18 = sadd.s32 1, %s621_s15   ;;  %s26_s19 = sadd.s32 1, %s617_s14 }
   0x7   : > { %s23_s20 = ssub.s32 %s621_s15, %s672_s18  ;;  %p33_p0 = scmp.ne.s32.totalorder %s617_s14, %s613_s13 }
   0x8   : > { %p24_p1 = scmp.eq.s32.totalorder %s23_s20, 0  ;;  %p34_p2 = scmp.eq.s32.totalorder %s621_s15, 0 }
   0x9   : > { %p39_p3 = scmp.ne.s32.totalorder %s613_s13, %s609_s12  ;;  %p40_p4 = scmp.eq.s32.totalorder %s668_s16, 0 }
   0xa   : > { %s684_s21 = scalar_select %p24_p1, %s617_s14, %s26_s19  }
   0xb   : > { %p686_p5 = por %p34_p2, %p33_p0  ;;  %p690_p6 = por %p40_p4, %p39_p3 }
   0xc   : > { %p105_p7 = scmp.eq.s32.totalorder %s668_s16, 1  ;;  %p111_p8 = scmp.eq.s32.totalorder %s439_s17, 1 }
   0xd   : > { %p471_p10 = scmp.lt.s32.totalorder %s621_s15, 2  ;;  %s137_s26 = sand.u32 1, %s617_s14  }
   0xe   : > { %p697_p11 = por %p105_p7, %p33_p0  ;;  %p701_p12 = por %p111_p8, %p39_p3 }
   0xf   : > { %s457_s27 = sshll.u32 %s621_s15, 6  ;;  %s442_s28 = sshll.u32 %s137_s26, 6 }
  0x10   : > { %s146_s4 = scalar_lea.hbm %s860_s0, %s457_s27  ;;  %s141_s6 = scalar_lea.vmem [#allocation2], %s442_s28 }
  0x11   : > { %s147_s5 = sshll.u32 %s146_s4, 4  ;;  %s149_s7 = sshll.u32 %s141_s6, 4  ;;  %s148_s5 = int_to_ptr.hbm [resolvable:$true] %s147_s5  ;;  %s150_s7 = int_to_ptr.vmem [resolvable:$true] %s149_s7 }
  0x12   : > { %p712_p13 = pnand %p471_p10, %p686_p5  ;;  %p445_p0 = scmp.ge.s32.totalorder %s621_s15, 1 }
  0x13   : > { %p157_p1 = scmp.lt.s32.totalorder %s621_s15, 3  ;;  %s138_s9 = scalar_lea.sflag [#allocation3], %s137_s26 }
  0x14   : > { %s525_s10 = sshra.s32 %s148_s5, 4  ;;  %p529_p3 = pneg %p712_p13  ;;  %s526_s10 = int_to_ptr.hbm [resolvable:$true] %s525_s10 }
  0x15   : > { %s527_s11 = scalar_lea.hbm %s526_s10, 64  ;;  %s532_s20 = scalar_lea.hbm %s860_s0, 128 }
  0x16   : > { %p528_p2 = scmp.ne.s32.totalorder %s526_s10, %s527_s11  ;;  %p533_p5 = scmp.lt.s32.totalorder %s526_s10, %s860_s0 }
  0x17   : > { %p534_p8 = scmp.lt.s32.totalorder %s532_s20, %s527_s11 }
  0x18   : > { %p530_p4 = pnand %p529_p3, %p528_p2 }
  0x19   : > { %p535_p10 = por %p534_p8, %p533_p5 }
  0x1a   : > { %p531_p7 = pneg %p530_p4 }
  0x1c   : > { %p536_p9 = pnand %p535_p10, %p531_p7 }
  0x1e   : > { %539 = shalt.err (!%p536_p9)
}
  0x1f   : > { %s623_s26 = smov 256   ;;  %s624_s28 = smov 16  }
  0x20   : > { %466 = dma.hbm_to_vmem [thread:$0]  (!%p712_p13), %s148_s5, 1024, %s150_s7, %s138_s9, %s623_s26, %s623_s26, %s624_s28  }
  0x21   : > { %p158_p2 = pnand %p445_p0, %p157_p1 }
  0x22   : > { %s733_s29 = sand.u32 (!%p158_p2), 1, %s613_s13  }
  0x23   : > { %161 = sbr.rel (%p158_p2) target bundleno = 358 (0x166), region = 32  ;;  %s446_s30 = sshll.u32 (!%p158_p2), %s733_s29, 6 }
  0x24   : > { %s164_s4 = scalar_lea.sflag (!%p158_p2), [#allocation3], %s733_s29  ;;  %s167_s6 = scalar_lea.vmem (!%p158_p2), [#allocation2], %s446_s30 }
  0x28   : > { %600 = dma.done.wait (%p690_p6), %s164_s4, 1024  }
  0x29   : > { %602 = vsyncadd (%p690_p6), %s164_s4, 4294966272  ;;  %v743_v0 = vld [vmem:[%s167_s6] sm:$0xff]  ;;  %v745_v1 = vld [vmem:[%s167_s6 + $0x8] sm:$0xff]  ;;  %vm223_vm0 = vcmask 15360   ;;  %s809_s23 = scalar_lea.vmem [#allocation5], %s446_s30  ;;  %s458_s5 = sshll.u32 %s668_s16, 6 }
  0x2a   : > { %v747_v2 = vld [vmem:[%s167_s6 + $0x20] sm:$0xff]  ;;  %v199_v3 = vadd.f32 %v745_v1, %v743_v0  ;;  %v751_v4 = vld [vmem:[%s167_s6 + $0x28] sm:$0xff]  ;;  %v755_v6 = vld [vmem:[%s167_s6 + $0x10] sm:$0xff]  ;;  %s362_s16 = scalar_lea.hbm %s863_s3, %s458_s5  ;;  %s363_s8 = sshll.u32 %s809_s23, 4  ;;  %s364_s8 = int_to_ptr.vmem [resolvable:$true] %s363_s8 }
  0x2b   : > { %v205_v5 = vadd.f32 %v751_v4, %v747_v2  ;;  %v757_v7 = vld [vmem:[%s167_s6 + $0x18] sm:$0xff]  ;;  %v759_v8 = vld [vmem:[%s167_s6 + $0x30] sm:$0xff]  ;;  %v215_v15 = vld [vmem:[%s861_s1] sm:$0xff]  ;;  %s365_s9 = sshll.u32 %s362_s16, 4  ;;  %s351_s10 = scalar_lea.sflag [#allocation4], %s733_s29  ;;  %s366_s9 = int_to_ptr.hbm [resolvable:$true] %s365_s9 }
  0x2c   : > { %200 = vadd.xlane.f32.xlu0 %v199_v3  ;;  %v761_v9 = vld [vmem:[%s167_s6 + $0x38] sm:$0xff]  ;;  %v202_v10 = vadd.f32 %v757_v7, %v755_v6  ;;  %v217_v17 = vld [vmem:[%s861_s1 + $0x10] sm:$0xff]  ;;  %v216_v18 = vld [vmem:[%s861_s1 + $0x8] sm:$0xff]  ;;  %s569_s11 = sshra.s32 %s366_s9, 4  ;;  %s575_s22 = scalar_lea.hbm %s863_s3, 128  ;;  %s570_s11 = int_to_ptr.hbm [resolvable:$true] %s569_s11 }
  0x2d   : > { %206 = vadd.xlane.f32.xlu1 %v205_v5  ;;  %v208_v11 = vadd.f32 %v761_v9, %v759_v8  ;;  %v218_v22 = vld [vmem:[%s861_s1 + $0x18] sm:$0xff]  ;;  %v240_v42 = vld [vmem:[%s862_s2 + $0x10] sm:$0xff]  ;;  %v238_v43 = vld [vmem:[%s862_s2] sm:$0xff]  ;;  %s571_s17 = scalar_lea.hbm %s570_s11, 64  ;;  %p576_p0 = scmp.lt.s32.totalorder %s570_s11, %s863_s3 }
  0x2e   : > { %v241_v41 = vld [vmem:[%s862_s2 + $0x18] sm:$0xff]  ;;  %v239_v51 = vld [vmem:[%s862_s2 + $0x8] sm:$0xff]  ;;  %p572_p6 = scmp.ne.s32.totalorder %s570_s11, %s571_s17  ;;  %p577_p1 = scmp.lt.s32.totalorder %s575_s22, %s571_s17 }
  0x30   : > { %p573_p9 = pnand %p572_p6, %p697_p11  ;;  %p578_p3 = por %p577_p1, %p576_p0 }
  0x32   : > { %p574_p13 = pneg %p573_p9 }
  0x34   : > { %203 = vadd.xlane.f32.xlu0 %v202_v10  ;;  %p579_p4 = pnand %p578_p3, %p574_p13 }
  0x35   : > { %209 = vadd.xlane.f32.xlu1 %v208_v11 }
  0x9f   : > { %v201_v12 = vpop.xlane.xlu0 %200 }
  0xa0   : > { %v207_v13 = vpop.xlane.xlu1 %206  ;;  %v211_v14 = vmul.f32 0.00390625, %v201_v12 }
  0xa1   : > { %v213_v16 = vmul.f32 0.00390625, %v207_v13 }
  0xa2   : > { %v219_v20 = vmul.f32 %v215_v15, %v211_v14 }
  0xa3   : > { %v221_v25 = vmul.f32 %v217_v17, %v213_v16 }
  0xa4   : > { %v224_v28 = vsel %vm223_vm0, %v219_v20, 0.0 }
  0xa5   : > { %v227_v31 = vsel %vm223_vm0, %v221_v25, 0.0 }
  0xa7   : > { %v204_v19 = vpop.xlane.xlu0 %203 }
  0xa8   : > { %v212_v21 = vmul.f32 0.00390625, %v204_v19  ;;  %v210_v23 = vpop.xlane.xlu1 %209 }
  0xa9   : > { %v214_v24 = vmul.f32 0.00390625, %v210_v23 }
  0xaa   : > { %v220_v26 = vmul.f32 %v216_v18, %v212_v21 }
  0xab   : > { %v222_v27 = vmul.f32 %v218_v22, %v214_v24 }
  0xac   : > { %v225_v29 = vsel %vm223_vm0, %v220_v26, 0.0 }
  0xad   : > { %v226_v30 = vadd.f32 %v225_v29, %v224_v28  ;;  %v229_v32 = vsel %vm223_vm0, %v222_v27, 0.0 }
  0xaf   : > { %v228_v33 = vadd.f32 %v227_v31, %v226_v30 }
  0xb1   : > { %v230_v34 = vadd.f32 %v229_v32, %v228_v33 }
  0xb3   : > { %v231_v35 = vrot.slane %v230_v34, 4 }
  0xb5   : > { %v232_v36 = vadd.f32 %v231_v35, %v230_v34 }
  0xb7   : > { %v233_v37 = vrot.slane %v232_v36, 2 }
  0xb9   : > { %v234_v38 = vadd.f32 %v233_v37, %v232_v36 }
  0xbb   : > { %v235_v39 = vrot.slane %v234_v38, 1 }
  0xbd   : > { %v236_v40 = vadd.f32 %v235_v39, %v234_v38 }
  0xbf   : > { %v237_v44 = vmax.f32 %v236_v40, 0.0 }
  0xc1   : > { %v245_v45 = vmul.f32 %v241_v41, %v237_v44  ;;  %v244_v46 = vmul.f32 %v240_v42, %v237_v44  ;;  %v242_v47 = vmul.f32 %v238_v43, %v237_v44  ;;  %v243_v52 = vmul.f32 %v239_v51, %v237_v44 }
  0xc3   : > { %v255_v48 = vsel %vm223_vm0, %v245_v45, 0.0  ;;  %v252_v49 = vsel %vm223_vm0, %v244_v46, 0.0  ;;  %v246_v50 = vsel %vm223_vm0, %v242_v47, 0.0  ;;  %v249_v53 = vsel %vm223_vm0, %v243_v52, 0.0 }
  0xc4   : > { %256 = vadd.xlane.f32.xlu1 %v255_v48  ;;  %253 = vadd.xlane.f32.xlu0 %v252_v49 }
  0xc5   : > { %247 = vadd.xlane.f32.xlu2 %v246_v50 }
  0xcd   : > { %250 = vadd.xlane.f32.xlu2 %v249_v53 }
 0x137   : > { %v257_v54 = vpop.xlane.xlu1 %256  ;;  %v254_v55 = vpop.xlane.xlu0 %253 }
 0x138   : > { %v451_v56 = vmul.f32 -1.442695, %v257_v54  ;;  %v450_v57 = vmul.f32 -1.442695, %v254_v55  ;;  %v248_v58 = vpop.xlane.xlu2 %247 }
 0x139   : > { %v448_v59 = vmul.f32 -1.442695, %v248_v58 }
 0x13a   : > { %509 = vpow2.f32 %v451_v56 }
 0x13b   : > { %511 = vpow2.f32 %v450_v57 }
 0x13c   : > { %513 = vpow2.f32 %v448_v59 }
 0x140   : > { %v510_v60 = vpop.eup %509  ;;  %v251_v61 = vpop.xlane.xlu2 %250 }
 0x141   : > { %v512_v62 = vpop.eup %511  ;;  %v273_v63 = vadd.f32 1.0, %v510_v60  ;;  %v449_v3 = vmul.f32 -1.442695, %v251_v61 }
 0x142   : > { %v514_v5 = vpop.eup %513  ;;  %v272_v10 = vadd.f32 1.0, %v512_v62 }
 0x143   : > { %515 = vrcp.f32 %v273_v63  ;;  %v270_v11 = vadd.f32 1.0, %v514_v5  ;;  %v328_v18 = vand.u32 2147483647, %v273_v63  ;;  %v330_v21 = vand.u32 2147483648, %v273_v63 }
 0x144   : > { %517 = vrcp.f32 %v272_v10  ;;  %v315_v23 = vand.u32 2147483648, %v272_v10  ;;  %vm324_vm2 = vweird.f32 %v273_v63  ;;  %v313_v27 = vand.u32 2147483647, %v272_v10 }
 0x145   : > { %519 = vpow2.f32 %v449_v3  ;;  %vm329_vm4 = vcmp.eq.f32.partialorder %v328_v18, 8.507059e+37  ;;  %vm309_vm5 = vweird.f32 %v272_v10  ;;  %v331_v30 = vor.u32 1.1754944e-38, %v330_v21 }
 0x146   : > { %521 = vrcp.f32 %v270_v11  ;;  %v316_v32 = vor.u32 1.1754944e-38, %v315_v23  ;;  %v285_v33 = vand.u32 2147483648, %v270_v11  ;;  %v283_v36 = vand.u32 2147483647, %v270_v11 }
 0x147   : > { %vm314_vm9 = vcmp.eq.f32.partialorder %v313_v27, 8.507059e+37  ;;  %vm279_vm10 = vweird.f32 %v270_v11 }
 0x148   : > { %v286_v46 = vor.u32 1.1754944e-38, %v285_v33  ;;  %vm284_vm12 = vcmp.eq.f32.partialorder %v283_v36, 8.507059e+37 }
 0x149   : > { %v516_v12 = vpop.eup %515 }
 0x14a   : > { %v518_v13 = vpop.eup %517  ;;  %v320_v14 = vmul.f32 %v516_v12, %v273_v63  ;;  %vm325_vm1 = vweird.f32 %v516_v12 }
 0x14b   : > { %v520_v15 = vpop.eup %519  ;;  %v305_v16 = vmul.f32 %v518_v13, %v272_v10  ;;  %vm310_vm3 = vweird.f32 %v518_v13  ;;  %vm326_vm6 = vmor %vm324_vm2, %vm325_vm1 }
 0x14c   : > { %v321_v17 = vsub.f32 1.0, %v320_v14  ;;  %v799_v19 = vadd.f32 1.0, %v520_v15  ;;  %v522_v20 = vpop.eup %521  ;;  %vm311_vm7 = vmor %vm309_vm5, %vm310_vm3 }
 0x14d   : > { %v306_v22 = vsub.f32 1.0, %v305_v16  ;;  %v275_v25 = vmul.f32 %v522_v20, %v270_v11  ;;  %vm280_vm8 = vweird.f32 %v522_v20 }
 0x14e   : > { %v322_v24 = vmul.f32 %v516_v12, %v321_v17  ;;  %523 = vrcp.f32 %v799_v19  ;;  %vm281_vm11 = vmor %vm279_vm10, %vm280_vm8  ;;  %v300_v49 = vand.u32 2147483648, %v799_v19  ;;  %v298_v51 = vand.u32 2147483647, %v799_v19 }
 0x14f   : > { %v307_v26 = vmul.f32 %v518_v13, %v306_v22  ;;  %v276_v29 = vsub.f32 1.0, %v275_v25  ;;  %vm294_vm14 = vweird.f32 %v799_v19 }
 0x150   : > { %v323_v28 = vadd.f32 %v516_v12, %v322_v24  ;;  %vm299_vm0 = vcmp.eq.f32.partialorder %v298_v51, 8.507059e+37 }
 0x151   : > { %v308_v31 = vadd.f32 %v518_v13, %v307_v26  ;;  %v277_v35 = vmul.f32 %v522_v20, %v276_v29 }
 0x152   : > { %v327_v34 = vsel %vm326_vm6, %v516_v12, %v323_v28 }
 0x153   : > { %v332_v37 = vsel %vm329_vm4, %v331_v30, %v327_v34  ;;  %v312_v38 = vsel %vm311_vm7, %v518_v13, %v308_v31  ;;  %v278_v43 = vadd.f32 %v522_v20, %v277_v35 }
 0x154   : > { %v524_v39 = vpop.eup %523  ;;  %v340_v40 = vmul.f32 %v332_v37, %v759_v8  ;;  %v341_v41 = vmul.f32 %v332_v37, %v761_v9  ;;  %v317_v42 = vsel %vm314_vm9, %v316_v32, %v312_v38 }
 0x155   : > { %v338_v44 = vmul.f32 %v317_v42, %v747_v2  ;;  %v339_v45 = vmul.f32 %v317_v42, %v751_v4  ;;  %v290_v47 = vmul.f32 %v524_v39, %v799_v19  ;;  %v282_v8 = vsel %vm281_vm11, %v522_v20, %v278_v43 }
 0x156   : > { %348 = vst [vmem:[%s809_s23 + $0x30] sm:$0xff] %v340_v40  ;;  %v287_v2 = vsel %vm284_vm12, %v286_v46, %v282_v8  ;;  %vm295_vm13 = vweird.f32 %v524_v39 }
 0x157   : > { %349 = vst [vmem:[%s809_s23 + $0x38] sm:$0xff] %v341_v41  ;;  %v291_v4 = vsub.f32 1.0, %v290_v47  ;;  %v334_v9 = vmul.f32 %v287_v2, %v743_v0  ;;  %v335_v48 = vmul.f32 %v287_v2, %v745_v1  ;;  %vm296_vm15 = vmor %vm294_vm14, %vm295_vm13  ;;  %v301_v0 = vor.u32 1.1754944e-38, %v300_v49 }
 0x158   : > { %346 = vst [vmem:[%s809_s23 + $0x20] sm:$0xff] %v338_v44 }
 0x159   : > { %347 = vst [vmem:[%s809_s23 + $0x28] sm:$0xff] %v339_v45  ;;  %v292_v50 = vmul.f32 %v524_v39, %v291_v4 }
 0x15a   : > { %342 = vst [vmem:[%s809_s23] sm:$0xff] %v334_v9 }
 0x15b   : > { %343 = vst [vmem:[%s809_s23 + $0x8] sm:$0xff] %v335_v48  ;;  %v293_v52 = vadd.f32 %v524_v39, %v292_v50 }
 0x15d   : > { %v297_v1 = vsel %vm296_vm15, %v524_v39, %v293_v52 }
 0x15e   : > { %v302_v53 = vsel %vm299_vm0, %v301_v0, %v297_v1 }
 0x15f   : > { %v336_v54 = vmul.f32 %v302_v53, %v755_v6  ;;  %v337_v55 = vmul.f32 %v302_v53, %v757_v7 }
 0x161   : > { %344 = vst [vmem:[%s809_s23 + $0x10] sm:$0xff] %v336_v54 }
 0x162   : > { %345 = vst [vmem:[%s809_s23 + $0x18] sm:$0xff] %v337_v55 }
 0x163   : > { %582 = shalt.err (!%p579_p4)
}
 0x164   : > { %s625_s29 = smov 256   ;;  %s626_s28 = smov 16  }
 0x165   : > { %461 = dma.vmem_to_hbm [thread:$0]  (%p697_p11), %s364_s8, 1024, %s366_s9, %s351_s10, %s625_s29, %s625_s29, %s626_s28  }
 0x166 PF: > { %s380_s4 = sand.u32 1, %s609_s12   ;;  %p869_p7 = scmp.ge.s32.totalorder %s621_s15, 2 }
 0x167   : > { %s381_s6 = scalar_lea.sflag [#allocation4], %s380_s4 }
 0x168   : > { %p468_p5 = pnand %p869_p7, %p701_p12 }
 0x16a   : > { %p469_p8 = pneg %p468_p5 }
 0x16c   : > { %604 = dma.done.wait (%p469_p8), %s381_s6, 1024  }
 0x16d   : > { %606 = vsyncadd (%p469_p8), %s381_s6, 4294966272  ;;  %p16_p10 = scmp.ge.s32.totalorder %s672_s18, 4   ;;  %s870_s12 = smov %s613_s13 }
 0x16e   : > { %s871_s13 = smov %s617_s14  ;;  %s872_s14 = smov %s684_s21 }
 0x16f   : > { %s873_s15 = smov %s672_s18  ;;  %18 = sbr.rel (!%p16_p10) target bundleno = 5 (0x5), region = 77 }
 0x174   :  { %387 = vsyncpa [#allocation3], 1 }
 0x175   :  { %389 = vsyncpa [#allocation3 + $0x1], 1 }
 0x176   :  { %390 = vsyncpa [#allocation4], 1 }
 0x177   :  { %392 = vsyncpa [#allocation4 + $0x1], 1 }

</bundles_post_ra>
